<compile_context>
chip_gen: v7x
topology: tpu7x:2x2x1
jax: 0.10.0
libtpu: 0.0.40
codegen_flags: <defaults>
</compile_context>

<pallas_src>
import jax
import jax.numpy as jnp
from jax.experimental import pallas as pl
from jax.experimental.pallas import tpu as pltpu


# -----------------------------------------------------------------------------
# Kernel
# -----------------------------------------------------------------------------
def make_tcn_kernel(level_cfgs, *, L, C, K, n_ds):
    """Build the fused TCN kernel body for one batch element (grid over B)."""

    def kernel(x_ref, w_ref, b_ref, *rest):
        # x_ref : (1, L, C) bf16      input (channel-padded, channel-last)
        # w_ref : (2*n_levels, K*C, C) bf16   im2col conv weights
        # b_ref : (2*n_levels, 1, C)   f32    conv biases
        # [dsw_ref : (n_ds, C, C) bf16, dsb_ref : (n_ds, 1, C) f32]
        # out_ref: (1, L, C) f32
        if n_ds:
            dsw_ref, dsb_ref, out_ref = rest
        else:
            dsw_ref = dsb_ref = None
            (out_ref,) = rest

        # Row index along time (sublanes); hoisted, reused by every conv.
        row = jax.lax.broadcasted_iota(jnp.int32, (L, C), 0)

        def causal_conv(v, w_bf16, bias_f32, dilation):
            # v: (L, C) f32 activation.  Build (L, K*C) im2col LHS where tap k
            # is the activation delayed by (K-1-k)*dilation with causal zeros.
            slabs = []
            for k in range(K):
                shift = (K - 1 - k) * dilation
                if shift == 0:
                    slabs.append(v)
                elif shift >= L:
                    slabs.append(jnp.zeros_like(v))
                else:
                    rolled = pltpu.roll(v, shift, axis=0)      # rolled[t] = v[t-shift]
                    slabs.append(jnp.where(row >= shift, rolled, 0.0))
            lhs = jnp.concatenate(slabs, axis=1).astype(jnp.bfloat16)  # (L, K*C)
            return jnp.dot(lhs, w_bf16,
                           preferred_element_type=jnp.float32) + bias_f32

        cur = x_ref[0].astype(jnp.float32)                      # (L, C)
        ds_idx = 0
        for i, cfg in enumerate(level_cfgs):                    # few levels; unrolled
            d = cfg["dilation"]
            h = jnp.maximum(causal_conv(cur, w_ref[2 * i], b_ref[2 * i], d), 0.0)
            h = jnp.maximum(causal_conv(h, w_ref[2 * i + 1], b_ref[2 * i + 1], d), 0.0)
            if cfg["has_downsample"]:
                res = jnp.dot(cur.astype(jnp.bfloat16), dsw_ref[ds_idx],
                              preferred_element_type=jnp.float32) + dsb_ref[ds_idx]
                ds_idx += 1
            else:
                res = cur
            cur = jnp.maximum(h + res, 0.0)
        out_ref[0] = cur

    return kernel


# -----------------------------------------------------------------------------
# Wrapper
# -----------------------------------------------------------------------------
def _fold_weight_norm(v, g):
    """torch weight_norm(dim=0): w = g * v / ||v|| (norm over all dims but 0)."""
    norm = jnp.sqrt(jnp.sum(v * v, axis=(1, 2), keepdims=True))
    return g * v / norm


def temporal_conv_net_forward(x_bcl, params, *, num_channels, kernel_size=2):
    """TemporalConvNet.forward: x (B, C_in, L) -> (B, num_channels[-1], L)."""
    B, c_in, L = x_bcl.shape
    K = kernel_size
    num_channels = list(num_channels)
    max_ch = max([c_in] + num_channels)
    C = ((max_ch + 127) // 128) * 128          # lane-dense common channel count

    conv_ws, conv_bs, ds_ws, ds_bs = [], [], [], []
    level_cfgs = []

    def pack_conv(w_eff, bias, ci, co):
        # (co, ci, K) -> tap-major (K, ci, co), zero channel-padded, im2col (K*C, C).
        wt = jnp.transpose(w_eff, (2, 1, 0)).astype(jnp.float32)       # (K, ci, co)
        wt = jnp.pad(wt, ((0, 0), (0, C - ci), (0, C - co)))
        wt = wt.reshape(K * C, C).astype(jnp.bfloat16)
        bp = jnp.pad(bias.astype(jnp.float32), (0, C - co)).reshape(1, C)
        return wt, bp

    in_ch = c_in
    for i, out_ch in enumerate(num_channels):
        lvl = params["levels"][i]
        w1, b1 = pack_conv(_fold_weight_norm(lvl["conv1_v"], lvl["conv1_g"]),
                           lvl["conv1_b"], in_ch, out_ch)
        w2, b2 = pack_conv(_fold_weight_norm(lvl["conv2_v"], lvl["conv2_g"]),
                           lvl["conv2_b"], out_ch, out_ch)
        conv_ws += [w1, w2]
        conv_bs += [b1, b2]
        has_ds = in_ch != out_ch
        if has_ds:
            wd = jnp.transpose(lvl["down_w"][:, :, 0], (1, 0)).astype(jnp.float32)
            wd = jnp.pad(wd, ((0, C - in_ch), (0, C - out_ch))).astype(jnp.bfloat16)
            bd = jnp.pad(lvl["down_b"].astype(jnp.float32),
                         (0, C - out_ch)).reshape(1, C)
            ds_ws.append(wd)
            ds_bs.append(bd)
        level_cfgs.append({"dilation": 2 ** i, "has_downsample": has_ds})
        in_ch = out_ch

    w_all = jnp.stack(conv_ws)                  # (2*n_levels, K*C, C) bf16
    b_all = jnp.stack(conv_bs)                  # (2*n_levels, 1, C)   f32
    n_ds = len(ds_ws)

    # Channel-last, channel-padded, bf16 input.  Padded channels carry zero
    # weights/biases everywhere, so they stay exactly zero through the net.
    x_blc = jnp.transpose(x_bcl, (0, 2, 1)).astype(jnp.float32)
    x_blc = jnp.pad(x_blc, ((0, 0), (0, 0), (0, C - c_in))).astype(jnp.bfloat16)

    inputs = [x_blc, w_all, b_all]
    in_specs = [pl.BlockSpec((1, L, C), lambda b: (b, 0, 0)),
                pl.BlockSpec(w_all.shape, lambda b: (0, 0, 0)),
                pl.BlockSpec(b_all.shape, lambda b: (0, 0, 0))]
    if n_ds:
        dsw_all = jnp.stack(ds_ws)              # (n_ds, C, C) bf16
        dsb_all = jnp.stack(ds_bs)              # (n_ds, 1, C) f32
        inputs += [dsw_all, dsb_all]
        in_specs += [pl.BlockSpec(dsw_all.shape, lambda b: (0, 0, 0)),
                     pl.BlockSpec(dsb_all.shape, lambda b: (0, 0, 0))]

    kernel = make_tcn_kernel(level_cfgs, L=L, C=C, K=K, n_ds=n_ds)

    out = pl.pallas_call(
        kernel,
        out_shape=jax.ShapeDtypeStruct((B, L, C), jnp.float32),
        grid_spec=pltpu.PrefetchScalarGridSpec(
            num_scalar_prefetch=0,
            grid=(B,),                                   # batch grid: pipelined
            in_specs=in_specs,
            out_specs=pl.BlockSpec((1, L, C), lambda b: (b, 0, 0)),
        ),
        compiler_params=pltpu.CompilerParams(
            dimension_semantics=("parallel",)),          # v7x: shard over 2 TCs
    )(*inputs)

    c_last = num_channels[-1]
    return jnp.transpose(out[:, :, :c_last], (0, 2, 1))  # (B, c_last, L)


# -----------------------------------------------------------------------------
# Plain-JAX reference (mirrors kernel numerics: bf16 MXU operands, f32 accum)
# -----------------------------------------------------------------------------
def reference_forward(x_bcl, params, *, num_channels, kernel_size=2):
    K = kernel_size

    def q(a):                                   # bf16 rounding of MXU operands
        return a.astype(jnp.bfloat16).astype(jnp.float32)

    cur = q(x_bcl.astype(jnp.float32))
    in_ch = cur.shape[1]
    for i, out_ch in enumerate(num_channels):
        d = 2 ** i
        pad = (K - 1) * d
        lvl = params["levels"][i]

        def cconv(v, w, bias, pad=pad, d=d):
            # v: (B, Ci, L); w: (Co, Ci, K) bf16-rounded; bias: (Co,)
            Bc, _, Lc = v.shape
            vp = jnp.pad(q(v), ((0, 0), (0, 0), (pad, 0)))
            out = jnp.zeros((Bc, w.shape[0], Lc), jnp.float32)
            for k in range(K):
                out = out + jnp.einsum('oc,bcl->bol', w[:, :, k],
                                       vp[:, :, k * d:k * d + Lc])
            return out + bias[None, :, None]

        w1 = q(_fold_weight_norm(lvl["conv1_v"], lvl["conv1_g"]))
        w2 = q(_fold_weight_norm(lvl["conv2_v"], lvl["conv2_g"]))
        h = jax.nn.relu(cconv(cur, w1, lvl["conv1_b"].astype(jnp.float32)))
        h = jax.nn.relu(cconv(h, w2, lvl["conv2_b"].astype(jnp.float32)))
        if in_ch != out_ch:
            res = (jnp.einsum('oc,bcl->bol', q(lvl["down_w"][:, :, 0]), q(cur))
                   + lvl["down_b"].astype(jnp.float32)[None, :, None])
        else:
            res = cur
        cur = jax.nn.relu(h + res)
        in_ch = out_ch
    return cur


# -----------------------------------------------------------------------------
# Parameter init (PyTorch-shaped: conv weight (out, in, K); weight_norm g=||v||)
# Larger std than the module's 0.01 so the check exercises the dilated taps.
# -----------------------------------------------------------------------------
def init_params(key, num_inputs, num_channels, kernel_size=2):
    params = {"levels": []}
    keys = jax.random.split(key, len(num_channels))
    in_ch = num_inputs
    for i, out_ch in enumerate(num_channels):
        k = jax.random.split(keys[i], 6)
        v1 = 0.5 * jax.random.normal(k[0], (out_ch, in_ch, kernel_size), jnp.float32)
        v2 = 0.5 * jax.random.normal(k[1], (out_ch, out_ch, kernel_size), jnp.float32)
        lvl = {
            "conv1_v": v1,
            "conv1_g": jnp.sqrt(jnp.sum(v1 * v1, axis=(1, 2), keepdims=True)),
            "conv1_b": jax.random.uniform(k[2], (out_ch,), jnp.float32, -0.5, 0.5),
            "conv2_v": v2,
            "conv2_g": jnp.sqrt(jnp.sum(v2 * v2, axis=(1, 2), keepdims=True)),
            "conv2_b": jax.random.uniform(k[3], (out_ch,), jnp.float32, -0.5, 0.5),
        }
        if in_ch != out_ch:
            lvl["down_w"] = 0.5 * jax.random.normal(k[4], (out_ch, in_ch, 1), jnp.float32)
            lvl["down_b"] = jax.random.uniform(k[5], (out_ch,), jnp.float32, -0.5, 0.5)
        params["levels"].append(lvl)
        in_ch = out_ch
    return params


if __name__ == "__main__":
    B, C_in, L = 2, 4, 16
    num_channels = [32, 32]          # two TemporalBlocks, dilations 1 and 2
    K = 2

    key = jax.random.PRNGKey(0)
    k_x, k_p = jax.random.split(key)
    x = jax.random.normal(k_x, (B, C_in, L), jnp.float32)     # (B, C, L)
    params = init_params(k_p, C_in, num_channels, kernel_size=K)

    out = temporal_conv_net_forward(x, params, num_channels=num_channels,
                                    kernel_size=K)
    out = jax.block_until_ready(out)

    ref = reference_forward(x, params, num_channels=num_channels, kernel_size=K)
    assert out.shape == (B, num_channels[-1], L), out.shape
    if not jnp.allclose(out, ref, atol=2e-3, rtol=2e-3):
        err = jnp.max(jnp.abs(out - ref))
        raise AssertionError(f"mismatch: max abs err {err}")

    print("KERNEL_OK")
</pallas_src>

<mosaic_0001>
module attributes {stable_mosaic.version = 11 : i64} {
  func.func @kernel(%arg0: i32, %arg1: memref<1x16x128xbf16, #tpu.memory_space<vmem>>, %arg2: memref<4x256x128xbf16, #tpu.memory_space<vmem>>, %arg3: memref<4x1x128xf32, #tpu.memory_space<vmem>>, %arg4: memref<1x128x128xbf16, #tpu.memory_space<vmem>>, %arg5: memref<1x1x128xf32, #tpu.memory_space<vmem>>, %arg6: memref<1x16x128xf32, #tpu.memory_space<vmem>>) attributes {dimension_semantics = [#tpu.dimension_semantics<parallel>], iteration_bounds = array<i64: 2>, scalar_prefetch = 0 : i64, scratch_operands = 0 : i64, tpu.core_type = #tpu.core_type<tc>, window_params = [{transform_indices = @transform_0, window_bounds = array<i64: 1, 16, 128>}, {pipeline_mode = #tpu.pipeline_mode<synchronous>, transform_indices = @transform_1, window_bounds = array<i64: 4, 256, 128>}, {pipeline_mode = #tpu.pipeline_mode<synchronous>, transform_indices = @transform_2, window_bounds = array<i64: 4, 1, 128>}, {pipeline_mode = #tpu.pipeline_mode<synchronous>, transform_indices = @transform_3, window_bounds = array<i64: 1, 128, 128>}, {pipeline_mode = #tpu.pipeline_mode<synchronous>, transform_indices = @transform_4, window_bounds = array<i64: 1, 1, 128>}, {transform_indices = @transform_5, window_bounds = array<i64: 1, 16, 128>}]} {
    %0 = tpu.iota {dimensions = array<i32: 0>} : vector<16x128xi32>
    %c0 = arith.constant 0 : index
    %c0_0 = arith.constant 0 : index
    %c0_1 = arith.constant 0 : index
    %1 = vector.load %arg1[%c0, %c0_0, %c0_1] : memref<1x16x128xbf16, #tpu.memory_space<vmem>>, vector<1x16x128xbf16>
    %2 = vector.shape_cast %1 : vector<1x16x128xbf16> to vector<16x128xbf16>
    %3 = arith.extf %2 : vector<16x128xbf16> to vector<16x128xf32>
    %c0_2 = arith.constant 0 : index
    %c0_3 = arith.constant 0 : index
    %c0_4 = arith.constant 0 : index
    %4 = vector.load %arg2[%c0_2, %c0_3, %c0_4] : memref<4x256x128xbf16, #tpu.memory_space<vmem>>, vector<1x256x128xbf16>
    %5 = vector.shape_cast %4 : vector<1x256x128xbf16> to vector<256x128xbf16>
    %c0_5 = arith.constant 0 : index
    %c0_6 = arith.constant 0 : index
    %c0_7 = arith.constant 0 : index
    %6 = vector.load %arg3[%c0_5, %c0_6, %c0_7] : memref<4x1x128xf32, #tpu.memory_space<vmem>>, vector<1x1x128xf32>
    %7 = vector.shape_cast %6 : vector<1x1x128xf32> to vector<1x128xf32>
    %c1_i32 = arith.constant 1 : i32
    %8 = tpu.dynamic_rotate %3 by %c1_i32 dim 0 : vector<16x128xf32>, i32 -> vector<16x128xf32>
    %c1_i32_8 = arith.constant 1 : i32
    %9 = vector.broadcast %c1_i32_8 : i32 to vector<16x128xi32>
    %10 = arith.cmpi sge, %0, %9 : vector<16x128xi32>
    %cst = arith.constant 0.000000e+00 : f32
    %11 = vector.broadcast %cst : f32 to vector<16x128xf32>
    %12 = arith.select %10, %8, %11 : vector<16x128xi1>, vector<16x128xf32>
    %13 = tpu.concatenate %12, %3 in 1 : vector<16x128xf32>, vector<16x128xf32> -> vector<16x256xf32>
    %14 = arith.truncf %13 : vector<16x256xf32> to vector<16x256xbf16>
    %cst_9 = arith.constant dense<0.000000e+00> : vector<16x128xf32>
    %15 = tpu.matmul %14, %5, %cst_9 {dimension_numbers = #tpu.dot_dimension_numbers<[1], [0], [0], [1], [0, 0, 1, 1], [], []>} : vector<16x256xbf16>, vector<256x128xbf16>, vector<16x128xf32> -> vector<16x128xf32>
    %16 = vector.broadcast %7 : vector<1x128xf32> to vector<16x128xf32>
    %17 = arith.addf %15, %16 : vector<16x128xf32>
    %cst_10 = arith.constant 0.000000e+00 : f32
    %18 = vector.broadcast %cst_10 : f32 to vector<16x128xf32>
    %19 = arith.maximumf %17, %18 : vector<16x128xf32>
    %c1 = arith.constant 1 : index
    %c0_11 = arith.constant 0 : index
    %c0_12 = arith.constant 0 : index
    %20 = vector.load %arg2[%c1, %c0_11, %c0_12] : memref<4x256x128xbf16, #tpu.memory_space<vmem>>, vector<1x256x128xbf16>
    %21 = vector.shape_cast %20 : vector<1x256x128xbf16> to vector<256x128xbf16>
    %c1_13 = arith.constant 1 : index
    %c0_14 = arith.constant 0 : index
    %c0_15 = arith.constant 0 : index
    %22 = vector.load %arg3[%c1_13, %c0_14, %c0_15] : memref<4x1x128xf32, #tpu.memory_space<vmem>>, vector<1x1x128xf32>
    %23 = vector.shape_cast %22 : vector<1x1x128xf32> to vector<1x128xf32>
    %c1_i32_16 = arith.constant 1 : i32
    %24 = tpu.dynamic_rotate %19 by %c1_i32_16 dim 0 : vector<16x128xf32>, i32 -> vector<16x128xf32>
    %c1_i32_17 = arith.constant 1 : i32
    %25 = vector.broadcast %c1_i32_17 : i32 to vector<16x128xi32>
    %26 = arith.cmpi sge, %0, %25 : vector<16x128xi32>
    %cst_18 = arith.constant 0.000000e+00 : f32
    %27 = vector.broadcast %cst_18 : f32 to vector<16x128xf32>
    %28 = arith.select %26, %24, %27 : vector<16x128xi1>, vector<16x128xf32>
    %29 = tpu.concatenate %28, %19 in 1 : vector<16x128xf32>, vector<16x128xf32> -> vector<16x256xf32>
    %30 = arith.truncf %29 : vector<16x256xf32> to vector<16x256xbf16>
    %cst_19 = arith.constant dense<0.000000e+00> : vector<16x128xf32>
    %31 = tpu.matmul %30, %21, %cst_19 {dimension_numbers = #tpu.dot_dimension_numbers<[1], [0], [0], [1], [0, 0, 1, 1], [], []>} : vector<16x256xbf16>, vector<256x128xbf16>, vector<16x128xf32> -> vector<16x128xf32>
    %32 = vector.broadcast %23 : vector<1x128xf32> to vector<16x128xf32>
    %33 = arith.addf %31, %32 : vector<16x128xf32>
    %cst_20 = arith.constant 0.000000e+00 : f32
    %34 = vector.broadcast %cst_20 : f32 to vector<16x128xf32>
    %35 = arith.maximumf %33, %34 : vector<16x128xf32>
    %36 = arith.truncf %3 : vector<16x128xf32> to vector<16x128xbf16>
    %c0_21 = arith.constant 0 : index
    %c0_22 = arith.constant 0 : index
    %c0_23 = arith.constant 0 : index
    %37 = vector.load %arg4[%c0_21, %c0_22, %c0_23] : memref<1x128x128xbf16, #tpu.memory_space<vmem>>, vector<1x128x128xbf16>
    %38 = vector.shape_cast %37 : vector<1x128x128xbf16> to vector<128x128xbf16>
    %cst_24 = arith.constant dense<0.000000e+00> : vector<16x128xf32>
    %39 = tpu.matmul %36, %38, %cst_24 {dimension_numbers = #tpu.dot_dimension_numbers<[1], [0], [0], [1], [0, 0, 1, 1], [], []>} : vector<16x128xbf16>, vector<128x128xbf16>, vector<16x128xf32> -> vector<16x128xf32>
    %c0_25 = arith.constant 0 : index
    %c0_26 = arith.constant 0 : index
    %c0_27 = arith.constant 0 : index
    %40 = vector.load %arg5[%c0_25, %c0_26, %c0_27] : memref<1x1x128xf32, #tpu.memory_space<vmem>>, vector<1x1x128xf32>
    %41 = vector.shape_cast %40 : vector<1x1x128xf32> to vector<1x128xf32>
    %42 = vector.broadcast %41 : vector<1x128xf32> to vector<16x128xf32>
    %43 = arith.addf %39, %42 : vector<16x128xf32>
    %44 = arith.addf %35, %43 : vector<16x128xf32>
    %cst_28 = arith.constant 0.000000e+00 : f32
    %45 = vector.broadcast %cst_28 : f32 to vector<16x128xf32>
    %46 = arith.maximumf %44, %45 : vector<16x128xf32>
    %c2 = arith.constant 2 : index
    %c0_29 = arith.constant 0 : index
    %c0_30 = arith.constant 0 : index
    %47 = vector.load %arg2[%c2, %c0_29, %c0_30] : memref<4x256x128xbf16, #tpu.memory_space<vmem>>, vector<1x256x128xbf16>
    %48 = vector.shape_cast %47 : vector<1x256x128xbf16> to vector<256x128xbf16>
    %c2_31 = arith.constant 2 : index
    %c0_32 = arith.constant 0 : index
    %c0_33 = arith.constant 0 : index
    %49 = vector.load %arg3[%c2_31, %c0_32, %c0_33] : memref<4x1x128xf32, #tpu.memory_space<vmem>>, vector<1x1x128xf32>
    %50 = vector.shape_cast %49 : vector<1x1x128xf32> to vector<1x128xf32>
    %c2_i32 = arith.constant 2 : i32
    %51 = tpu.dynamic_rotate %46 by %c2_i32 dim 0 : vector<16x128xf32>, i32 -> vector<16x128xf32>
    %c2_i32_34 = arith.constant 2 : i32
    %52 = vector.broadcast %c2_i32_34 : i32 to vector<16x128xi32>
    %53 = arith.cmpi sge, %0, %52 : vector<16x128xi32>
    %cst_35 = arith.constant 0.000000e+00 : f32
    %54 = vector.broadcast %cst_35 : f32 to vector<16x128xf32>
    %55 = arith.select %53, %51, %54 : vector<16x128xi1>, vector<16x128xf32>
    %56 = tpu.concatenate %55, %46 in 1 : vector<16x128xf32>, vector<16x128xf32> -> vector<16x256xf32>
    %57 = arith.truncf %56 : vector<16x256xf32> to vector<16x256xbf16>
    %cst_36 = arith.constant dense<0.000000e+00> : vector<16x128xf32>
    %58 = tpu.matmul %57, %48, %cst_36 {dimension_numbers = #tpu.dot_dimension_numbers<[1], [0], [0], [1], [0, 0, 1, 1], [], []>} : vector<16x256xbf16>, vector<256x128xbf16>, vector<16x128xf32> -> vector<16x128xf32>
    %59 = vector.broadcast %50 : vector<1x128xf32> to vector<16x128xf32>
    %60 = arith.addf %58, %59 : vector<16x128xf32>
    %cst_37 = arith.constant 0.000000e+00 : f32
    %61 = vector.broadcast %cst_37 : f32 to vector<16x128xf32>
    %62 = arith.maximumf %60, %61 : vector<16x128xf32>
    %c3 = arith.constant 3 : index
    %c0_38 = arith.constant 0 : index
    %c0_39 = arith.constant 0 : index
    %63 = vector.load %arg2[%c3, %c0_38, %c0_39] : memref<4x256x128xbf16, #tpu.memory_space<vmem>>, vector<1x256x128xbf16>
    %64 = vector.shape_cast %63 : vector<1x256x128xbf16> to vector<256x128xbf16>
    %c3_40 = arith.constant 3 : index
    %c0_41 = arith.constant 0 : index
    %c0_42 = arith.constant 0 : index
    %65 = vector.load %arg3[%c3_40, %c0_41, %c0_42] : memref<4x1x128xf32, #tpu.memory_space<vmem>>, vector<1x1x128xf32>
    %66 = vector.shape_cast %65 : vector<1x1x128xf32> to vector<1x128xf32>
    %c2_i32_43 = arith.constant 2 : i32
    %67 = tpu.dynamic_rotate %62 by %c2_i32_43 dim 0 : vector<16x128xf32>, i32 -> vector<16x128xf32>
    %c2_i32_44 = arith.constant 2 : i32
    %68 = vector.broadcast %c2_i32_44 : i32 to vector<16x128xi32>
    %69 = arith.cmpi sge, %0, %68 : vector<16x128xi32>
    %cst_45 = arith.constant 0.000000e+00 : f32
    %70 = vector.broadcast %cst_45 : f32 to vector<16x128xf32>
    %71 = arith.select %69, %67, %70 : vector<16x128xi1>, vector<16x128xf32>
    %72 = tpu.concatenate %71, %62 in 1 : vector<16x128xf32>, vector<16x128xf32> -> vector<16x256xf32>
    %73 = arith.truncf %72 : vector<16x256xf32> to vector<16x256xbf16>
    %cst_46 = arith.constant dense<0.000000e+00> : vector<16x128xf32>
    %74 = tpu.matmul %73, %64, %cst_46 {dimension_numbers = #tpu.dot_dimension_numbers<[1], [0], [0], [1], [0, 0, 1, 1], [], []>} : vector<16x256xbf16>, vector<256x128xbf16>, vector<16x128xf32> -> vector<16x128xf32>
    %75 = vector.broadcast %66 : vector<1x128xf32> to vector<16x128xf32>
    %76 = arith.addf %74, %75 : vector<16x128xf32>
    %cst_47 = arith.constant 0.000000e+00 : f32
    %77 = vector.broadcast %cst_47 : f32 to vector<16x128xf32>
    %78 = arith.maximumf %76, %77 : vector<16x128xf32>
    %79 = arith.addf %78, %46 : vector<16x128xf32>
    %cst_48 = arith.constant 0.000000e+00 : f32
    %80 = vector.broadcast %cst_48 : f32 to vector<16x128xf32>
    %81 = arith.maximumf %79, %80 : vector<16x128xf32>
    %c0_49 = arith.constant 0 : index
    %c0_50 = arith.constant 0 : index
    %c0_51 = arith.constant 0 : index
    %82 = vector.load %arg6[%c0_49, %c0_50, %c0_51] : memref<1x16x128xf32, #tpu.memory_space<vmem>>, vector<1x16x128xf32>
    %83 = vector.shape_cast %82 : vector<1x16x128xf32> to vector<16x128xf32>
    %84 = vector.shape_cast %81 : vector<16x128xf32> to vector<1x16x128xf32>
    tpu.vector_store %arg6[%c0_49, %c0_50, %c0_51], %84 {strides = array<i32>} : memref<1x16x128xf32, #tpu.memory_space<vmem>>, vector<1x16x128xf32>,
    return
  }
  func.func @transform_0(%arg0: i32) -> (i32, i32, i32) {
    %c0_i32 = arith.constant 0 : i32
    %c0_i32_0 = arith.constant 0 : i32
    %c0_i32_1 = arith.constant 0 : i32
    return %arg0, %c0_i32, %c0_i32_0 : i32, i32, i32
  }
  func.func @transform_1(%arg0: i32) -> (i32, i32, i32) {
    %c0_i32 = arith.constant 0 : i32
    %c0_i32_0 = arith.constant 0 : i32
    %c0_i32_1 = arith.constant 0 : i32
    %c0_i32_2 = arith.constant 0 : i32
    return %c0_i32, %c0_i32_0, %c0_i32_1 : i32, i32, i32
  }
  func.func @transform_2(%arg0: i32) -> (i32, i32, i32) {
    %c0_i32 = arith.constant 0 : i32
    %c0_i32_0 = arith.constant 0 : i32
    %c0_i32_1 = arith.constant 0 : i32
    %c0_i32_2 = arith.constant 0 : i32
    return %c0_i32, %c0_i32_0, %c0_i32_1 : i32, i32, i32
  }
  func.func @transform_3(%arg0: i32) -> (i32, i32, i32) {
    %c0_i32 = arith.constant 0 : i32
    %c0_i32_0 = arith.constant 0 : i32
    %c0_i32_1 = arith.constant 0 : i32
    %c0_i32_2 = arith.constant 0 : i32
    return %c0_i32, %c0_i32_0, %c0_i32_1 : i32, i32, i32
  }
  func.func @transform_4(%arg0: i32) -> (i32, i32, i32) {
    %c0_i32 = arith.constant 0 : i32
    %c0_i32_0 = arith.constant 0 : i32
    %c0_i32_1 = arith.constant 0 : i32
    %c0_i32_2 = arith.constant 0 : i32
    return %c0_i32, %c0_i32_0, %c0_i32_1 : i32, i32, i32
  }
  func.func @transform_5(%arg0: i32) -> (i32, i32, i32) {
    %c0_i32 = arith.constant 0 : i32
    %c0_i32_0 = arith.constant 0 : i32
    %c0_i32_1 = arith.constant 0 : i32
    return %arg0, %c0_i32, %c0_i32_0 : i32, i32, i32
  }
}

</mosaic_0001>

<bundles_post_ra>
// kernel: tpu_custom_call.1
= control target key start
LH: loop header
LB: loop body
LE: loop exit
PB: predicated region body
PF: predicated region fallthrough
CT: control target
= control target key end

     0   :  { %10 = vsyncpa [#allocation3], 0  ;;  %s2158_s0 = inlined_call_operand.hbm [shape: bf16[2,16,128], index: 0, kind: input, shape index: {}]   ;;  %s2159_s1 = inlined_call_operand.hbm [shape: bf16[4,256,128], index: 1, kind: input, shape index: {}]   ;;  %s2160_s2 = inlined_call_operand.vmem [shape: f32[4,1,128], index: 2, kind: input, shape index: {}]   ;;  %s2161_s3 = inlined_call_operand.hbm [shape: bf16[1,128,128], index: 3, kind: input, shape index: {}]   ;;  %s2162_s4 = inlined_call_operand.vmem [shape: f32[1,1,128], index: 4, kind: input, shape index: {}]   ;;  %s2163_s5 = inlined_call_operand.hbm [shape: f32[2,16,128], index: 5, kind: output, shape index: {}]  }
   0x1   :  { %12 = vsyncpa [#allocation3 + $0x1], 0 }
   0x2   :  { %13 = vsyncpa [#allocation6], 0 }
   0x3   :  { %14 = vsyncpa [#allocation4], 0 }
   0x4   :  { %16 = vsyncpa [#allocation4 + $0x1], 0  ;;  %s1848_s18 = smov 0   ;;  %s1850_s19 = smov 0  }
   0x5   :  { %s1852_s20 = smov 0   ;;  %s1854_s21 = smov 0  }
   0x6 LB: > { %s1869_s22 = sadd.s32 4294967295, %s1805_s21   ;;  %s1270_s23 = sadd.s32 4294967294, %s1805_s21   ;;  %s1805_s21 = sphi %s1854_s21, %s2187_s21   ;;  %s1801_s20 = sphi %s1852_s20, %s2186_s20   ;;  %s1797_s19 = sphi %s1850_s19, %s2185_s19   ;;  %s1793_s18 = sphi %s1848_s18, %s2184_s18  }
   0x7   : > { %p42_p0 = scmp.ne.s32.totalorder %s1797_s19, %s1793_s18  ;;  %p2164_p1 = scmp.eq.s32.totalorder %s1869_s22, 0 }
   0x8   : > { %p156_p3 = scmp.eq.s32.totalorder %s1270_s23, 1  ;;  %p1271_p5 = scmp.ge.s32.totalorder %s1805_s21, 1 }
   0x9   : > { %p1878_p4 = por %p2164_p1, %p42_p0  ;;  %p163_p7 = scmp.lt.s32.totalorder %s1805_s21, 3 }
   0xa   : > { %p1883_p6 = por %p156_p3, %p42_p0  ;;  %s1807_s27 = smov [#allocation5]  }
   0xb   : > { %s2167_s24 = scalar_select %p1878_p4, 1, 0 }
   0xc   : > { %s2168_s25 = scalar_select %p1883_p6, 1, 0 }
   0xd   : > { %p1888_p8 = pnand %p1271_p5, %p163_p7  ;;  %s175_s28 = sshll.u32 %s1807_s27, 4  ;;  %s1892_s28 = int_to_ptr.vmem [resolvable:$true] %s175_s28 }
   0xe   : > { %s1808_s30 = smov [#allocation7]   ;;  %s1649_s9 = scalar_lea.hbm %s2159_s1, 8192 }
   0xf   : > { %p1513_p9 = pneg %p1888_p8  ;;  %s191_s6 = sshll.u32 %s1808_s30, 4  ;;  %s1903_s6 = int_to_ptr.vmem [resolvable:$true] %s191_s6 }
  0x10   : > { %p1650_p12 = scmp.ne.s32.totalorder %s2159_s1, %s1649_s9  ;;  %p1656_p5 = scmp.lt.u32.totalorder %s1649_s9, %s2159_s1 }
  0x11   : > { %p1899_p11 = pnand %p1513_p9, %p2164_p1 }
  0x13   : > { %p1651_p13 = pneg %p1899_p11 }
  0x15   : > { %p1652_p0 = pnand %p1651_p13, %p1650_p12 }
  0x17   : > { %p1653_p3 = pneg %p1652_p0 }
  0x19   : > { %p1658_p7 = pnand %p1656_p5, %p1653_p3 }
  0x1b   : > { %1661 = shalt.err (!%p1658_p7)
}
  0x1c   : > { %s1662_s14 = scalar_lea.vmem %s1892_s28, 8192  ;;  %p1670_p2 = scmp.lt.s32.totalorder %s1892_s28, %s1892_s28 }
  0x1d   : > { %p1663_p9 = scmp.ne.s32.totalorder %s1892_s28, %s1662_s14  ;;  %p1671_p12 = scmp.lt.s32.totalorder %s1662_s14, %s1662_s14 }
  0x1f   : > { %p1665_p10 = pnand %p1663_p9, %p1651_p13  ;;  %p1672_p0 = por %p1671_p12, %p1670_p2 }
  0x21   : > { %p1666_p1 = pneg %p1665_p10 }
  0x23   : > { %p1673_p6 = pnand %p1672_p0, %p1666_p1 }
  0x25   : > { %1676 = shalt.err (!%p1673_p6)
}
  0x26   : > { %s1809_s15 = smov 64   ;;  %s1810_s16 = smov 4  }
  0x27   : > { %1516 = dma.hbm_to_vmem [thread:$0]  (!%p1899_p11), %s2159_s1, 8192, %s1892_s28, [#allocation6], %s1809_s15, %s1809_s15, %s1810_s16  }
  0x28   : > { %s1677_s7 = scalar_lea.hbm %s2161_s3, 1024 }
  0x29   : > { %p1678_p1 = scmp.ne.s32.totalorder %s2161_s3, %s1677_s7  ;;  %p1684_p10 = scmp.lt.u32.totalorder %s1677_s7, %s2161_s3 }
  0x2b   : > { %p1680_p2 = pnand %p1678_p1, %p1651_p13 }
  0x2d   : > { %p1681_p6 = pneg %p1680_p2 }
  0x2f   : > { %p1686_p3 = pnand %p1684_p10, %p1681_p6 }
  0x31   : > { %1689 = shalt.err (!%p1686_p3)
}
  0x32   : > { %s1690_s28 = scalar_lea.vmem %s1903_s6, 1024  ;;  %p1698_p12 = scmp.lt.s32.totalorder %s1903_s6, %s1903_s6 }
  0x33   : > { %p1691_p5 = scmp.ne.s32.totalorder %s1903_s6, %s1690_s28  ;;  %p1699_p0 = scmp.lt.s32.totalorder %s1690_s28, %s1690_s28 }
  0x35   : > { %p1693_p7 = pnand %p1691_p5, %p1651_p13  ;;  %p1700_p1 = por %p1699_p0, %p1698_p12 }
  0x37   : > { %p1694_p9 = pneg %p1693_p7 }
  0x39   : > { %p1701_p2 = pnand %p1700_p1, %p1694_p9 }
  0x3b   : > { %1704 = shalt.err (!%p1701_p2)
}
  0x3c   : > { %1519 = dma.hbm_to_vmem [thread:$0]  (!%p1899_p11), %s2161_s3, 1024, %s1903_s6, [#allocation6], %s1809_s15, %s1809_s15, %s1810_s16  }
  0x3d   : > { %s1964_s29 = sadd.s32 1, %s1805_s21   ;;  %s29_s14 = sadd.s32 1, %s1801_s20 }
  0x3e   : > { %s26_s17 = ssub.s32 %s1805_s21, %s1964_s29  ;;  %p36_p13 = scmp.ne.s32.totalorder %s1801_s20, %s1797_s19 }
  0x3f   : > { %p27_p6 = scmp.eq.s32.totalorder %s26_s17, 0  ;;  %p37_p10 = scmp.eq.s32.totalorder %s1805_s21, 0 }
  0x40   : > { %p2171_p3 = scmp.eq.s32.totalorder %s1869_s22, 1  ;;  %p1530_p7 = scmp.lt.s32.totalorder %s1805_s21, 2 }
  0x41   : > { %s1980_s27 = scalar_select %p27_p6, %s1801_s20, %s29_s14  }
  0x42   : > { %p1974_p5 = por %p2171_p3, %p36_p13  ;;  %p38_p9 = por %p37_p10, %p36_p13 }
  0x43   : > { %s208_s30 = sand.u32 1, %s1801_s20   ;;  %s1382_s6 = sshll.u32 %s1805_s21, 7 }
  0x44   : > { %s2172_s23 = scalar_select %p1974_p5, 1, 0 }
  0x45   : > { %s1275_s7 = sshll.u32 %s208_s30, 3  ;;  %s1987_s10 = scalar_lea.hbm %s2158_s0, %s1382_s6 }
  0x46   : > { %s212_s11 = scalar_lea.vmem [#allocation2], %s1275_s7  ;;  %p1991_p11 = pnand %p1530_p7, %p38_p9 }
  0x47   : > { %s219_s28 = sshll.u32 %s212_s11, 4  ;;  %s1995_s13 = scalar_lea.sflag [#allocation3], %s208_s30  ;;  %s1989_s28 = int_to_ptr.vmem [resolvable:$true] %s219_s28 }
  0x48   : > { %s1705_s14 = scalar_lea.hbm %s1987_s10, 128  ;;  %p1707_p0 = pneg %p1991_p11 }
  0x49   : > { %p1706_p12 = scmp.ne.s32.totalorder %s1987_s10, %s1705_s14  ;;  %s1710_s6 = scalar_lea.hbm %s2158_s0, 256 }
  0x4a   : > { %p1711_p13 = scmp.lt.u32.totalorder %s1987_s10, %s2158_s0  ;;  %p1712_p6 = scmp.lt.u32.totalorder %s1710_s6, %s1705_s14 }
  0x4b   : > { %p1708_p1 = pnand %p1707_p0, %p1706_p12  ;;  %p1714_p3 = scmp.lt.u32.totalorder %s1705_s14, %s1987_s10 }
  0x4c   : > { %p1713_p10 = por %p1712_p6, %p1711_p13 }
  0x4d   : > { %p1709_p2 = pneg %p1708_p1 }
  0x4e   : > { %p1715_p7 = por %p1714_p3, %p1713_p10 }
  0x50   : > { %p1716_p9 = pnand %p1715_p7, %p1709_p2 }
  0x52   : > { %1719 = shalt.err (!%p1716_p9)
}
  0x53   : > { %s1720_s30 = scalar_lea.vmem %s1989_s28, 128  ;;  %s1811_s11 = smov [#allocation2]  }
  0x54   : > { %p1721_p12 = scmp.ne.s32.totalorder %s1989_s28, %s1720_s30  ;;  %s1725_s17 = sshll.u32 %s1811_s11, 4  ;;  %s1726_s17 = int_to_ptr.vmem [resolvable:$false] %s1725_s17 }
  0x55   : > { %s1727_s7 = scalar_lea.vmem %s1726_s17, 256  ;;  %p1728_p4 = scmp.lt.s32.totalorder %s1989_s28, %s1726_s17 }
  0x56   : > { %p1723_p1 = pnand %p1721_p12, %p1707_p0  ;;  %p1729_p13 = scmp.lt.s32.totalorder %s1727_s7, %s1720_s30 }
  0x58   : > { %p1724_p5 = pneg %p1723_p1  ;;  %p1730_p6 = por %p1729_p13, %p1728_p4 }
  0x5a   : > { %p1731_p10 = pnand %p1730_p6, %p1724_p5 }
  0x5c   : > { %1734 = shalt.err (!%p1731_p10)
}
  0x5d   : > { %1523 = dma.hbm_to_vmem [thread:$0]  (!%p1991_p11), %s1987_s10, 128, %s1989_s28, %s1995_s13, %s1809_s15, %s1809_s15, %s1810_s16  }
  0x5e   : > { %231 = sbr.rel (%p1888_p8) target bundleno = 1060 (0x424), region = 40  ;;  %s2029_s14 = sand.u32 (!%p1888_p8), 1, %s1797_s19  }
  0x5f   : > { %s1279_s6 = sshll.u32 (!%p1888_p8), %s2029_s14, 3  ;;  %s234_s8 = scalar_lea.sflag (!%p1888_p8), [#allocation3], %s2029_s14 }
  0x60   : > { %s237_s9 = scalar_lea.vmem (!%p1888_p8), [#allocation2], %s1279_s6  ;;  %p2174_p4 = scmp.ne.s32.totalorder (!%p1888_p8), %s2167_s24, 0 }
  0x65   : > { %1780 = dma.done.wait (%p2174_p4), %s234_s8, 128  }
  0x66   : > { %1782 = vsyncadd (%p2174_p4), %s234_s8, 4294967168  ;;  %p2175_p5 = scmp.eq.s32.totalorder %s1869_s22, 0 }
  0x68   : > { %1784 = dma.done.wait (%p2175_p5), [#allocation6], 9216   ;;  %p2176_p11 = pmov %p2175_p5 }
  0x69   : > { %v1575_v0 = vld [vmem:[#allocation5 + $0x40] sm:$0xff]   ;;  %v1577_v2 = vld [vmem:[#allocation5 + $0x48] sm:$0xff]   ;;  %v1579_v4 = vld [vmem:[#allocation5 + $0x50] sm:$0xff]   ;;  %v273_v9 = vlaneseq  ;;  %vm1812_vm1 = vmmov 1   ;;  %v1813_v37 = vmov 0.0   ;;  %vm1814_vm4 = vmmov 0  }
  0x6a   : > { %1786 = vsyncadd (%p2176_p11), [#allocation6], 4294958080  ;;  %v1576_v1 = vld [vmem:[#allocation5] sm:$0xff]   ;;  %1384 = vmatprep.subr.bf16.mxu0 %v1575_v0  ;;  %v1578_v3 = vld [vmem:[#allocation5 + $0x8] sm:$0xff]   ;;  %s1282_s30 = sshll.u32 %s2029_s14, 4  ;;  %s1383_s8 = sshll.u32 %s1869_s22, 8 }
  0x6b   : > { %1385 = vmatpush3.bf16.msra.mxu0 %v1576_v1  ;;  %v1580_v5 = vld [vmem:[#allocation5 + $0x10] sm:$0xff]   ;;  %v1581_v6 = vld [vmem:[#allocation5 + $0x58] sm:$0xff]   ;;  %v1583_v8 = vld [vmem:[#allocation5 + $0x60] sm:$0xff]   ;;  %v2043_v14 = vshrl.u32 %v273_v9, 7  ;;  %s271_s7 = scalar_lea.vmem [#allocation8], %s1282_s30  ;;  %s2114_s26 = scalar_lea.hbm %s2163_s5, %s1383_s8 }
  0x6c   : > { %1386 = vmatprep.subr.bf16.mxu0 %v1577_v2  ;;  %v1582_v7 = vld [vmem:[#allocation5 + $0x18] sm:$0xff]   ;;  %v1584_v10 = vld [vmem:[#allocation5 + $0x20] sm:$0xff]   ;;  %v1585_v11 = vld [vmem:[#allocation5 + $0x68] sm:$0xff]   ;;  %s1178_s6 = sshll.u32 %s271_s7, 4  ;;  %s1165_s15 = scalar_lea.sflag [#allocation4], %s2029_s14  ;;  %s2108_s6 = int_to_ptr.vmem [resolvable:$true] %s1178_s6 }
  0x6d   : > { %v2041_v12 = vld [vmem:[%s237_s9] sm:$0xff]   ;;  %v1586_v13 = vld [vmem:[#allocation5 + $0x28] sm:$0xff]   ;;  %v1592_v15 = vld [vmem:[#allocation5 + $0xc0] sm:$0xff]   ;;  %vm318_vm0 = vcmp.ge.s32.totalorder %v2043_v14, 1  ;;  %vm315_vm3 = vcmp.lt.s32.totalorder %v2043_v14, 1  ;;  %vm819_vm5 = vcmp.ge.s32.totalorder %v2043_v14, 2 }
  0x6e   : > { %v278_v16 = vunpack.c.l.bf16 %v2041_v12  ;;  %v1593_v17 = vld [vmem:[#allocation5 + $0x80] sm:$0xff]   ;;  %v1587_v18 = vld [vmem:[#allocation5 + $0x70] sm:$0xff]   ;;  %v279_v19 = vunpack.c.h.bf16 %v2041_v12  ;;  %458 = vmatprep.mubr.bf16.mxu0 %v2041_v12  ;;  %v1595_v20 = vld [vmem:[#allocation5 + $0xc8] sm:$0xff]   ;;  %1406 = vmatprep.subr.bf16.mxu1 %v1592_v15  ;;  %vm816_vm6 = vcmp.lt.s32.totalorder %v2043_v14, 2  ;;  %s1735_s16 = scalar_lea.vmem %s2108_s6, 256  ;;  %p2181_p0 = scmp.ne.s32.totalorder %s2172_s23, 0 }
  0x6f   : > { %1387 = vmatpush3.bf16.msra.mxu0 %v1578_v3  ;;  %1407 = vmatpush3.bf16.msra.mxu1 %v1593_v17  ;;  %v1596_v21 = vld [vmem:[#allocation5 + $0x88] sm:$0xff]   ;;  %v1588_v22 = vld [vmem:[#allocation5 + $0x30] sm:$0xff]   ;;  %vm2050_vm2 = vmpackc.low %vm1812_vm1, %vm318_vm0  ;;  %p1736_p8 = scmp.ne.s32.totalorder %s2108_s6, %s1735_s16  ;;  %s1815_s22 = smov [#allocation8]  }
  0x70   : > { %1388 = vmatprep.subr.bf16.mxu0 %v1579_v4  ;;  %v313_v23 = vrot.slane %v278_v16, 7  ;;  %1408 = vmatprep.subr.bf16.mxu1 %v1595_v20  ;;  %v314_v24 = vrot.slane %v279_v19, 7  ;;  %v1598_v26 = vld [vmem:[#allocation5 + $0xd0] sm:$0xff]   ;;  %v1589_v27 = vld [vmem:[#allocation5 + $0x78] sm:$0xff]   ;;  %v1594_v34 = vld [vmem:[#allocation7] sm:$0xff]   ;;  %s1739_s10 = sshll.u32 %s1815_s22, 4  ;;  %s1740_s10 = int_to_ptr.vmem [resolvable:$false] %s1739_s10 }
  0x71   : > { %v1599_v28 = vld [vmem:[#allocation5 + $0x90] sm:$0xff]   ;;  %v1601_v29 = vld [vmem:[#allocation5 + $0xd8] sm:$0xff]   ;;  %v1604_v35 = vld [vmem:[#allocation5 + $0xe0] sm:$0xff]   ;;  %p1737_p2 = pnand %p1736_p8, %p2181_p0  ;;  %s1741_s28 = scalar_lea.vmem %s1740_s10, 512 }
  0x72   : > { %v1590_v30 = vld [vmem:[#allocation5 + $0x38] sm:$0xff]   ;;  %v316_v31 = vsel %vm315_vm3, %v313_v23, %v314_v24  ;;  %v317_v32 = vsel %vm315_vm3, %v314_v24, %v313_v23  ;;  %v1597_v38 = vld [vmem:[#allocation7 + $0x8] sm:$0xff]   ;;  %v1600_v39 = vld [vmem:[#allocation7 + $0x10] sm:$0xff]   ;;  %p1742_p7 = scmp.lt.s32.totalorder %s2108_s6, %s1740_s10  ;;  %p1743_p9 = scmp.lt.s32.totalorder %s1741_s28, %s1735_s16 }
  0x73   : > { %1389 = vmatpush3.bf16.msra.mxu0 %v1580_v5  ;;  %1409 = vmatpush3.bf16.msra.mxu1 %v1596_v21  ;;  %v1602_v33 = vld [vmem:[#allocation5 + $0x98] sm:$0xff]   ;;  %v1302_v36 = vpack.c.bf16 %v316_v31, %v317_v32  ;;  %v1605_v41 = vld [vmem:[#allocation5 + $0xa0] sm:$0xff]   ;;  %v1607_v43 = vld [vmem:[#allocation5 + $0xe8] sm:$0xff]   ;;  %p1738_p3 = pneg %p1737_p2 }
  0x74   : > { %1390 = vmatprep.subr.bf16.mxu0 %v1581_v6  ;;  %1410 = vmatprep.subr.bf16.mxu1 %v1598_v26  ;;  %v1603_v40 = vld [vmem:[#allocation7 + $0x18] sm:$0xff]   ;;  %v1606_v42 = vld [vmem:[#allocation7 + $0x20] sm:$0xff]   ;;  %v1608_v44 = vld [vmem:[#allocation5 + $0xa8] sm:$0xff]   ;;  %p1744_p12 = por %p1743_p9, %p1742_p7 }
  0x75   : > { %v1609_v45 = vld [vmem:[#allocation7 + $0x28] sm:$0xff]   ;;  %v1610_v46 = vld [vmem:[#allocation5 + $0xf0] sm:$0xff]   ;;  %v1613_v48 = vld [vmem:[#allocation5 + $0xf8] sm:$0xff]  }
  0x76   : > { %v1611_v47 = vld [vmem:[#allocation5 + $0xb0] sm:$0xff]   ;;  %v1614_v50 = vld [vmem:[#allocation5 + $0xb8] sm:$0xff]   ;;  %v1616_v52 = vld [vmem:[#allocation5 + $0x140] sm:$0xff]   ;;  %p1745_p1 = pnand %p1744_p12, %p1738_p3 }
  0x77   : > { %1391 = vmatpush3.bf16.msra.mxu0 %v1582_v7  ;;  %1411 = vmatpush3.bf16.msra.mxu1 %v1599_v28  ;;  %v1612_v49 = vld [vmem:[#allocation7 + $0x30] sm:$0xff]   ;;  %v1615_v51 = vld [vmem:[#allocation7 + $0x38] sm:$0xff]   ;;  %v1617_v5 = vld [vmem:[#allocation5 + $0x100] sm:$0xff]  }
  0x78   : > { %1392 = vmatprep.subr.bf16.mxu0 %v1583_v8  ;;  %1412 = vmatprep.subr.bf16.mxu1 %v1601_v29  ;;  %v1284_v55 = vld [vmem:[%s2160_s2] ss:$0 sm:$0xff]  ;;  %v1618_v7 = vld [vmem:[#allocation5 + $0x148] sm:$0xff]   ;;  %v1625_v16 = vld [vmem:[#allocation5 + $0x120] sm:$0xff]  }
  0x79   : > { %v1619_v8 = vld [vmem:[#allocation5 + $0x108] sm:$0xff]   ;;  %v1620_v9 = vld [vmem:[#allocation5 + $0x150] sm:$0xff]   ;;  %v1630_v24 = vld [vmem:[#allocation5 + $0x178] sm:$0xff]  }
  0x7a   : > { %v1626_v20 = vld [vmem:[#allocation5 + $0x168] sm:$0xff]   ;;  %v1629_v23 = vld [vmem:[#allocation5 + $0x130] sm:$0xff]   ;;  %v1631_v25 = vld [vmem:[#allocation5 + $0x138] sm:$0xff]  }
  0x7b   : > { %1393 = vmatpush3.bf16.msra.mxu0 %v1584_v10  ;;  %1413 = vmatpush3.bf16.msra.mxu1 %v1602_v33  ;;  %v1621_v10 = vld [vmem:[#allocation5 + $0x110] sm:$0xff]   ;;  %v1627_v21 = vld [vmem:[#allocation5 + $0x128] sm:$0xff]   ;;  %v1632_v26 = vld [vmem:[#allocation5 + $0x1c0] sm:$0xff]  }
  0x7c   : > { %1394 = vmatprep.subr.bf16.mxu0 %v1585_v11  ;;  %1414 = vmatprep.subr.bf16.mxu1 %v1604_v35  ;;  %v1622_v11 = vld [vmem:[#allocation5 + $0x158] sm:$0xff]   ;;  %v1634_v28 = vld [vmem:[#allocation5 + $0x1c8] sm:$0xff]   ;;  %v1637_v31 = vld [vmem:[#allocation5 + $0x190] sm:$0xff]  }
  0x7d   : > { %v1635_v29 = vld [vmem:[#allocation5 + $0x188] sm:$0xff]   ;;  %v1638_v32 = vld [vmem:[#allocation5 + $0x1d8] sm:$0xff]   ;;  %vm2084_vm7 = vmpackc.low %vm1812_vm1, %vm819_vm5 }
  0x7e   : > { %v1639_v33 = vld [vmem:[#allocation5 + $0x198] sm:$0xff]  }
  0x7f   : > { %1395 = vmatpush3.bf16.msra.mxu0 %v1586_v13  ;;  %1415 = vmatpush3.bf16.msra.mxu1 %v1605_v41  ;;  %v1624_v13 = vld [vmem:[#allocation5 + $0x160] sm:$0xff]  }
  0x80   : > { %1396 = vmatprep.subr.bf16.mxu0 %v1587_v18  ;;  %1416 = vmatprep.subr.bf16.mxu1 %v1607_v43 }
  0x83   : > { %1397 = vmatpush3.bf16.msra.mxu0 %v1588_v22  ;;  %1417 = vmatpush3.bf16.msra.mxu1 %v1608_v44  ;;  %v1628_v22 = vld [vmem:[#allocation5 + $0x170] sm:$0xff]  }
  0x84   : > { %1398 = vmatprep.subr.bf16.mxu0 %v1589_v27  ;;  %1418 = vmatprep.subr.bf16.mxu1 %v1610_v46  ;;  %v1633_v27 = vld [vmem:[#allocation5 + $0x180] sm:$0xff]  }
  0x87   : > { %1399 = vmatpush3.bf16.msra.mxu0 %v1590_v30  ;;  %1419 = vmatpush3.bf16.msra.mxu1 %v1611_v47  ;;  %v1636_v30 = vld [vmem:[#allocation5 + $0x1d0] sm:$0xff]  }
  0x88   : > { %1481 = vmatprep.subr.bf16.mxu0 %v1813_v37  ;;  %1420 = vmatprep.subr.bf16.mxu1 %v1613_v48 }
  0x8a   : > { %1303 = vmatmul.mubr.msk.bf16.vlgmr.msra.gmra.mrb[0].mxu0 %vm2050_vm2, %v1302_v36  ;;  %v1305_v36 = vld [vmem:[%s2160_s2 + $0x1] ss:$0 sm:$0xff] }
  0x8b   : > { %1482 = vmatpush3.bf16.msra.mxu0 %v1594_v34  ;;  %1421 = vmatpush3.bf16.msra.mxu1 %v1614_v50  ;;  %v1640_v34 = vld [vmem:[#allocation5 + $0x1e0] sm:$0xff]  }
  0x8c   : > { %1483 = vmatprep.subr.bf16.mxu0 %v1813_v37  ;;  %1497 = vmatprep.mubr.msk.bf16.mxu0 %vm1814_vm4, %v1813_v37 }
  0x8d   : > { %1437 = vmatprep.subr.bf16.mxu1 %v1616_v52 }
  0x8f   : > { %1484 = vmatpush3.bf16.msra.mxu0 %v1597_v38  ;;  %v1325_v38 = vld [vmem:[%s2162_s4] ss:$0 sm:$0xff] }
  0x90   : > { %1485 = vmatprep.subr.bf16.mxu0 %v1813_v37 }
  0x93   : > { %1486 = vmatpush3.bf16.msra.mxu0 %v1600_v39 }
  0x94   : > { %1487 = vmatprep.subr.bf16.mxu0 %v1813_v37 }
  0x97   : > { %1488 = vmatpush3.bf16.msra.mxu0 %v1603_v40 }
  0x98   : > { %1489 = vmatprep.subr.bf16.mxu0 %v1813_v37 }
  0x9b   : > { %1490 = vmatpush3.bf16.msra.mxu0 %v1606_v42 }
  0x9c   : > { %1491 = vmatprep.subr.bf16.mxu0 %v1813_v37 }
  0x9f   : > { %1492 = vmatpush3.bf16.msra.mxu0 %v1609_v45 }
  0xa0   : > { %1493 = vmatprep.subr.bf16.mxu0 %v1813_v37 }
  0xa3   : > { %1494 = vmatpush3.bf16.msra.mxu0 %v1612_v49 }
  0xa4   : > { %1495 = vmatprep.subr.bf16.mxu0 %v1813_v37 }
  0xa7   : > { %1496 = vmatpush3.bf16.msra.mxu0 %v1615_v51 }
  0xa8   : > { %1459 = vmatprep.subr.bf16.mxu0 %v1632_v26 }
  0xaa   : > { %1498 = vmatmul.mubr.bf16.vlgmr.msra.gmra.mrb[4].mxu0 %v2041_v12  ;;  %v1623_v12 = vld [vmem:[#allocation5 + $0x118] sm:$0xff]  }
  0xab   : > { %1460 = vmatpush3.bf16.msra.mxu0 %v1633_v27 }
  0xac   : > { %1461 = vmatprep.subr.bf16.mxu0 %v1634_v28 }
  0xaf   : > { %1462 = vmatpush3.bf16.msra.mxu0 %v1635_v29 }
  0xb0   : > { %1463 = vmatprep.subr.bf16.mxu0 %v1636_v30 }
  0xb3   : > { %1464 = vmatpush3.bf16.msra.mxu0 %v1637_v31 }
  0xb4   : > { %1465 = vmatprep.subr.bf16.mxu0 %v1638_v32 }
  0xb7   : > { %1466 = vmatpush3.bf16.msra.mxu0 %v1639_v33 }
  0xb8   : > { %1467 = vmatprep.subr.bf16.mxu0 %v1640_v34 }
 0x15d   : > { %v1400_v53 = vpop.f32.mrb[0].mxu0 }
 0x15e   : > { %v1401_v54 = vpop.f32.mrb[1].mxu0 }
 0x15f   : > { %v1402_v56 = vadd.f32 %v1401_v54, %v1400_v53  ;;  %v1403_v57 = vpop.f32.mrb[2].mxu0 }
 0x160   : > { %v1404_v58 = vpop.f32.mrb[3].mxu0 }
 0x161   : > { %v1405_v59 = vadd.f32 %v1404_v58, %v1403_v57  ;;  %v461_v60 = vadd.f32 %v1402_v56, %v1284_v55 }
 0x163   : > { %v464_v61 = vadd.f32 %v1405_v59, %v1284_v55  ;;  %v467_v62 = vmax.f32 %v461_v60, 0.0  ;;  %v1641_v60 = vld [vmem:[#allocation5 + $0x1a0] sm:$0xff]  }
 0x164   : > { %1468 = vmatpush3.bf16.msra.mxu0 %v1641_v60 }
 0x165   : > { %v468_v63 = vmax.f32 %v464_v61, 0.0  ;;  %v504_v0 = vrot.slane %v467_v62, 7  ;;  %v1642_v61 = vld [vmem:[#allocation5 + $0x1e8] sm:$0xff]  }
 0x166   : > { %1469 = vmatprep.subr.bf16.mxu0 %v1642_v61 }
 0x167   : > { %v505_v1 = vrot.slane %v468_v63, 7  ;;  %v511_v2 = vpack.c.bf16 %v468_v63, %v467_v62  ;;  %v1643_v62 = vld [vmem:[#allocation5 + $0x1a8] sm:$0xff]   ;;  %v1644_v63 = vld [vmem:[#allocation5 + $0x1f0] sm:$0xff]  }
 0x168   : > { %1470 = vmatpush3.bf16.msra.mxu0 %v1643_v62 }
 0x169   : > { %646 = vmatprep.mubr.bf16.mxu1 %v511_v2  ;;  %v506_v3 = vsel %vm315_vm3, %v504_v0, %v505_v1  ;;  %v507_v4 = vsel %vm315_vm3, %v505_v1, %v504_v0  ;;  %v1645_v0 = vld [vmem:[#allocation5 + $0x1b0] sm:$0xff]   ;;  %1471 = vmatprep.subr.bf16.mxu0 %v1644_v63  ;;  %v1646_v1 = vld [vmem:[#allocation5 + $0x1f8] sm:$0xff]  }
 0x16a   : > { %v1323_v6 = vpack.c.bf16 %v506_v3, %v507_v4  ;;  %v1647_v2 = vld [vmem:[#allocation5 + $0x1b8] sm:$0xff]   ;;  %v1336_v4 = vld [vmem:[%s2160_s2 + $0x2] ss:$0 sm:$0xff] }
 0x16c   : > { %1324 = vmatmul.mubr.msk.bf16.vlgmr.msra.gmra.mrb[0].mxu1 %vm2050_vm2, %v1323_v6  ;;  %1472 = vmatpush3.bf16.msra.mxu0 %v1645_v0 }
 0x16d   : > { %1438 = vmatpush3.bf16.msra.mxu1 %v1617_v5  ;;  %1473 = vmatprep.subr.bf16.mxu0 %v1646_v1 }
 0x16e   : > { %1439 = vmatprep.subr.bf16.mxu1 %v1618_v7 }
 0x170   : > { %1474 = vmatpush3.bf16.msra.mxu0 %v1647_v2 }
 0x171   : > { %1440 = vmatpush3.bf16.msra.mxu1 %v1619_v8 }
 0x172   : > { %1441 = vmatprep.subr.bf16.mxu1 %v1620_v9 }
 0x175   : > { %1442 = vmatpush3.bf16.msra.mxu1 %v1621_v10 }
 0x176   : > { %1443 = vmatprep.subr.bf16.mxu1 %v1622_v11 }
 0x179   : > { %1444 = vmatpush3.bf16.msra.mxu1 %v1623_v12 }
 0x17a   : > { %1445 = vmatprep.subr.bf16.mxu1 %v1624_v13 }
 0x17d   : > { %v768_v15 = vpop.f32.mrb[4].mxu0  ;;  %1446 = vmatpush3.bf16.msra.mxu1 %v1625_v16 }
 0x17e   : > { %v1499_v17 = vpop.f32.mrb[5].mxu0  ;;  %1447 = vmatprep.subr.bf16.mxu1 %v1626_v20  ;;  %v769_v43 = vadd.f32 %v1325_v38, %v768_v15 }
 0x17f   : > { %v771_v18 = vpop.f32.mrb[6].mxu0 }
 0x180   : > { %v1500_v19 = vpop.f32.mrb[7].mxu0  ;;  %v772_v49 = vadd.f32 %v1325_v38, %v771_v18 }
 0x181   : > { %1448 = vmatpush3.bf16.msra.mxu1 %v1627_v21 }
 0x182   : > { %1449 = vmatprep.subr.bf16.mxu1 %v1628_v22  ;;  %v1357_v22 = vld [vmem:[%s2160_s2 + $0x3] ss:$0 sm:$0xff] }
 0x185   : > { %1450 = vmatpush3.bf16.msra.mxu1 %v1629_v23 }
 0x186   : > { %1451 = vmatprep.subr.bf16.mxu1 %v1630_v24 }
 0x189   : > { %1452 = vmatpush3.bf16.msra.mxu1 %v1631_v25 }
 0x23f   : > { %v1422_v35 = vpop.f32.mrb[0].mxu1 }
 0x240   : > { %v1423_v37 = vpop.f32.mrb[1].mxu1 }
 0x241   : > { %v1424_v39 = vadd.f32 %v1423_v37, %v1422_v35  ;;  %v1425_v40 = vpop.f32.mrb[2].mxu1 }
 0x242   : > { %v1426_v41 = vpop.f32.mrb[3].mxu1 }
 0x243   : > { %v649_v42 = vadd.f32 %v1424_v39, %v1305_v36  ;;  %v1427_v44 = vadd.f32 %v1426_v41, %v1425_v40 }
 0x245   : > { %v655_v45 = vmax.f32 %v649_v42, 0.0  ;;  %v652_v46 = vadd.f32 %v1427_v44, %v1305_v36 }
 0x247   : > { %v775_v47 = vadd.f32 %v769_v43, %v655_v45  ;;  %v656_v48 = vmax.f32 %v652_v46, 0.0 }
 0x249   : > { %v777_v50 = vmax.f32 %v775_v47, 0.0  ;;  %v776_v51 = vadd.f32 %v772_v49, %v656_v48 }
 0x24b   : > { %v2077_v52 = vmax.f32 %v776_v51, 0.0  ;;  %v814_v53 = vrot.slane %v777_v50, 6 }
 0x24d   : > { %v815_v54 = vrot.slane %v2077_v52, 6  ;;  %v824_v55 = vpack.c.bf16 %v2077_v52, %v777_v50 }
 0x24f   : > { %v817_v57 = vsel %vm816_vm6, %v814_v53, %v815_v54  ;;  %v818_v58 = vsel %vm816_vm6, %v815_v54, %v814_v53  ;;  %959 = vmatprep.mubr.bf16.mxu1 %v824_v55 }
 0x250   : > { %v1354_v59 = vpack.c.bf16 %v817_v57, %v818_v58 }
 0x252   : > { %1355 = vmatmul.mubr.msk.bf16.vlgmr.msra.gmra.mrb[4].mxu1 %vm2084_vm7, %v1354_v59 }
 0x325   : > { %v1453_v3 = vpop.f32.mrb[4].mxu1 }
 0x326   : > { %v1454_v5 = vpop.f32.mrb[5].mxu1 }
 0x327   : > { %v1455_v6 = vadd.f32 %v1454_v5, %v1453_v3  ;;  %v1456_v7 = vpop.f32.mrb[6].mxu1 }
 0x328   : > { %v1457_v8 = vpop.f32.mrb[7].mxu1 }
 0x329   : > { %v962_v9 = vadd.f32 %v1455_v6, %v1336_v4  ;;  %v1458_v10 = vadd.f32 %v1457_v8, %v1456_v7 }
 0x32b   : > { %v968_v11 = vmax.f32 %v962_v9, 0.0  ;;  %v965_v12 = vadd.f32 %v1458_v10, %v1336_v4 }
 0x32d   : > { %v969_v13 = vmax.f32 %v965_v12, 0.0  ;;  %v1005_v15 = vrot.slane %v968_v11, 6 }
 0x32f   : > { %v1006_v16 = vrot.slane %v969_v13, 6  ;;  %v1012_v17 = vpack.c.bf16 %v969_v13, %v968_v11 }
 0x331   : > { %v1007_v18 = vsel %vm816_vm6, %v1005_v15, %v1006_v16  ;;  %v1008_v19 = vsel %vm816_vm6, %v1006_v16, %v1005_v15  ;;  %1147 = vmatprep.mubr.bf16.mxu0 %v1012_v17 }
 0x332   : > { %v1375_v20 = vpack.c.bf16 %v1007_v18, %v1008_v19 }
 0x334   : > { %1376 = vmatmul.mubr.msk.bf16.vlgmr.msra.gmra.mrb[8].mxu0 %vm2084_vm7, %v1375_v20 }
 0x407   : > { %v1475_v21 = vpop.f32.mrb[8].mxu0 }
 0x408   : > { %v1476_v23 = vpop.f32.mrb[9].mxu0 }
 0x409   : > { %v1477_v24 = vadd.f32 %v1476_v23, %v1475_v21  ;;  %v1478_v25 = vpop.f32.mrb[10].mxu0 }
 0x40a   : > { %v1479_v26 = vpop.f32.mrb[11].mxu0 }
 0x40b   : > { %v1150_v27 = vadd.f32 %v1477_v24, %v1357_v22  ;;  %v1480_v14 = vadd.f32 %v1479_v26, %v1478_v25 }
 0x40d   : > { %v1156_v28 = vmax.f32 %v1150_v27, 0.0  ;;  %v1153_v29 = vadd.f32 %v1480_v14, %v1357_v22 }
 0x40f   : > { %v1158_v30 = vadd.f32 %v1156_v28, %v777_v50  ;;  %v1157_v31 = vmax.f32 %v1153_v29, 0.0 }
 0x411   : > { %v1160_v32 = vmax.f32 %v1158_v30, 0.0  ;;  %v1159_v33 = vadd.f32 %v1157_v31, %v2077_v52 }
 0x413   : > { %1162 = vst [vmem:[%s271_s7] sm:$0xff] %v1160_v32  ;;  %v1161_v34 = vmax.f32 %v1159_v33, 0.0 }
 0x415   : > { %1163 = vst [vmem:[%s271_s7 + $0x8] sm:$0xff] %v1161_v34 }
 0x416   : > { %1748 = shalt.err (!%p1745_p1)
}
 0x417   : > { %s1749_s12 = scalar_lea.hbm %s2114_s26, 256  ;;  %s1753_s11 = scalar_lea.hbm %s2163_s5, 512 }
 0x418   : > { %p1750_p13 = scmp.ne.s32.totalorder %s2114_s26, %s1749_s12  ;;  %p1754_p4 = scmp.lt.u32.totalorder %s2114_s26, %s2163_s5 }
 0x419   : > { %p1755_p5 = scmp.lt.u32.totalorder %s1753_s11, %s1749_s12  ;;  %p1757_p8 = scmp.lt.u32.totalorder %s1749_s12, %s2114_s26 }
 0x41a   : > { %p1751_p6 = pnand %p1750_p13, %p2181_p0 }
 0x41b   : > { %p1756_p11 = por %p1755_p5, %p1754_p4 }
 0x41c   : > { %p1752_p10 = pneg %p1751_p6 }
 0x41d   : > { %p1758_p2 = por %p1757_p8, %p1756_p11 }
 0x41f   : > { %p1759_p3 = pnand %p1758_p2, %p1752_p10 }
 0x421   : > { %1762 = shalt.err (!%p1759_p3)
}
 0x422   : > { %s1816_s8 = smov 128   ;;  %s1817_s9 = smov 8  }
 0x423   : > { %1511 = dma.vmem_to_hbm [thread:$0]  (%p2181_p0), %s2108_s6, 256, %s2114_s26, %s1165_s15, %s1816_s8, %s1816_s8, %s1817_s9  }
 0x424 PF: > { %s1193_s24 = sand.u32 1, %s1793_s18   ;;  %p2182_p7 = scmp.ne.s32.totalorder %s2168_s25, 0 }
 0x425   : > { %p2183_p9 = scmp.ge.s32.totalorder %s1805_s21, 2  ;;  %s1194_s16 = scalar_lea.sflag [#allocation4], %s1193_s24 }
 0x427   : > { %p1525_p12 = pnand %p2183_p9, %p2182_p7 }
 0x429   : > { %1788 = dma.done.wait (!%p1525_p12), %s1194_s16, 256  }
 0x42a   : > { %1790 = vsyncadd (!%p1525_p12), %s1194_s16, 4294967040  ;;  %p19_p1 = scmp.ge.s32.totalorder %s1964_s29, 4   ;;  %s2184_s18 = smov %s1797_s19 }
 0x42b   : > { %s2185_s19 = smov %s1801_s20  ;;  %s2186_s20 = smov %s1980_s27 }
 0x42c   : > { %s2187_s21 = smov %s1964_s29  ;;  %21 = sbr.rel (!%p19_p1) target bundleno = 6 (0x6), region = 99 }
 0x433   :  { %1199 = vsyncpa [#allocation3], 1 }
 0x434   :  { %1201 = vsyncpa [#allocation3 + $0x1], 1 }
 0x435   :  { %1202 = vsyncpa [#allocation6], 1 }
 0x436   :  { %1203 = vsyncpa [#allocation4], 1 }
 0x437   :  { %1205 = vsyncpa [#allocation4 + $0x1], 1 }

</bundles_post_ra>
